<compile_context>
chip_gen: v7x
topology: tpu7x:2x2x1
jax: 0.10.0
libtpu: 0.0.40
codegen_flags: <defaults>
</compile_context>

<pallas_src>
import jax
import jax.numpy as jnp
from jax.experimental import pallas as pl
from jax.experimental.pallas import tpu as pltpu


# ----------------------------------------------------------------------------
# Pallas kernel: single program, all operands VMEM-resident.
#   h      = A_hat @ (x @ W1) + b1          (GCNConv)
#   hn     = relu(BN_train(h))              (batch stats, eps=1e-5)
#   g      = pool @ hn                      (global_add_pool)
#   out    = log_softmax(g @ W2 + b2)
# ----------------------------------------------------------------------------
def gcn_forward_kernel(x_ref, a_ref, pool_ref, w1_ref, b1_ref, gamma_ref,
                       beta_ref, w2_ref, b2_ref, out_ref):
    # GCNConv feature path: x@W1 first (tiny in_dim), then aggregate with A_hat.
    # bf16 operands, f32 accumulation on the MXU.
    xw1 = jnp.dot(x_ref[...], w1_ref[...],
                  preferred_element_type=jnp.float32)          # [N, 64] f32
    h = jnp.dot(a_ref[...], xw1.astype(jnp.bfloat16),
                preferred_element_type=jnp.float32)            # [N, 64] f32
    h = h + b1_ref[...]

    # BatchNorm1d, training-mode batch statistics (biased variance), two-pass.
    inv_n = 1.0 / h.shape[0]
    mean = jnp.sum(h, axis=0, keepdims=True) * inv_n
    centered = h - mean
    var = jnp.sum(centered * centered, axis=0, keepdims=True) * inv_n
    scale = gamma_ref[...] * jax.lax.rsqrt(var + 1e-5)
    hn = centered * scale + beta_ref[...]
    hn = jnp.maximum(hn, 0.0)                                   # ReLU

    # global_add_pool: one-hot(batch) @ hn -> [G, 64]; kept f32 (tiny, exact).
    g = jnp.dot(pool_ref[...], hn, preferred_element_type=jnp.float32)

    # Linear + log_softmax.
    logits = jnp.dot(g.astype(jnp.bfloat16), w2_ref[...],
                     preferred_element_type=jnp.float32) + b2_ref[...]
    z = logits - jnp.max(logits, axis=-1, keepdims=True)
    out_ref[...] = z - jnp.log(jnp.sum(jnp.exp(z), axis=-1, keepdims=True))


def gcn_forward(x, a_norm, pool, w1, b1, gamma, beta, w2, b2):
    g_count = pool.shape[0]
    out_dim = w2.shape[1]

    # bf16 matmul operands for conv/fc; per-feature params, pool matrix and all
    # elementwise math stay f32.
    x16 = x.astype(jnp.bfloat16)
    a16 = a_norm.astype(jnp.bfloat16)      # no-op if builder already emits bf16
    w1_16 = w1.astype(jnp.bfloat16)
    w2_16 = w2.astype(jnp.bfloat16)

    vmem = pl.BlockSpec(memory_space=pltpu.MemorySpace.VMEM)
    return pl.pallas_call(
        gcn_forward_kernel,
        out_shape=jax.ShapeDtypeStruct((g_count, out_dim), jnp.float32),
        in_specs=[vmem] * 9,
        out_specs=vmem,
    )(x16, a16, pool, w1_16, b1, gamma, beta, w2_16, b2)


# ----------------------------------------------------------------------------
# Plain-JAX glue: dense GCN-normalized adjacency and pooling matrix.
# ----------------------------------------------------------------------------
def build_gcn_norm_adj(edge_index, num_nodes):
    """Dense \\hat{A} = D^{-1/2} (A + I) D^{-1/2}, laid out as A[dst, src]
    (matches PyG gcn_norm with add_self_loops=True, edge_weight=1).
    Emitted directly in bf16 so the cast fuses with the scatter."""
    # TODO(synk): for large, genuinely sparse graphs replace this dense O(N^2)
    # matrix with a CSR + scalar-prefetch gather aggregation.
    src, dst = edge_index[0], edge_index[1]
    loop = jnp.arange(num_nodes, dtype=src.dtype)
    src = jnp.concatenate([src, loop])
    dst = jnp.concatenate([dst, loop])
    ones = jnp.ones(src.shape[0], dtype=jnp.float32)
    deg = jnp.zeros((num_nodes,), jnp.float32).at[dst].add(ones)
    dinv = jnp.where(deg > 0, 1.0 / jnp.sqrt(deg), 0.0)
    w = dinv[src] * dinv[dst]
    a = jnp.zeros((num_nodes, num_nodes), jnp.float32).at[dst, src].add(w)
    return a.astype(jnp.bfloat16)


def build_pool_matrix(batch, num_graphs):
    return (batch[None, :] == jnp.arange(num_graphs)[:, None]).astype(jnp.float32)


# ----------------------------------------------------------------------------
# Deterministic parameter init (synthetic; shapes from the module's __init__).
# ----------------------------------------------------------------------------
def init_params(in_dim, hidden, out_dim, key):
    k1, k3, k4 = jax.random.split(key, 3)
    w1 = jax.random.normal(k1, (in_dim, hidden), jnp.float32) * (1.0 / jnp.sqrt(in_dim))
    b1 = jnp.zeros((1, hidden), jnp.float32)           # GCNConv bias (PyG zero-init)
    gamma = jnp.ones((1, hidden), jnp.float32)
    beta = jnp.zeros((1, hidden), jnp.float32)
    w2 = jax.random.normal(k3, (hidden, out_dim), jnp.float32) * (1.0 / jnp.sqrt(hidden))
    b2 = jax.random.normal(k4, (1, out_dim), jnp.float32) * 0.01
    return w1, b1, gamma, beta, w2, b2


if __name__ == "__main__":
    key = jax.random.PRNGKey(0)
    G = 4               # number of graphs (batched per kernel call)
    nodes_per_graph = 8
    N = G * nodes_per_graph
    in_dim, hidden, out_dim = 8, 64, 4

    kx, kp = jax.random.split(key)
    x = jax.random.normal(kx, (N, in_dim), jnp.float32)

    # G undirected 8-node ring graphs.
    edges = []
    for g in range(G):
        base = g * nodes_per_graph
        for i in range(nodes_per_graph):
            u, v = base + i, base + (i + 1) % nodes_per_graph
            edges.append((u, v))
            edges.append((v, u))
    edge_index = jnp.array(edges, dtype=jnp.int32).T           # [2, E]
    batch = jnp.repeat(jnp.arange(G, dtype=jnp.int32), nodes_per_graph)

    w1, b1, gamma, beta, w2, b2 = init_params(in_dim, hidden, out_dim, kp)

    @jax.jit
    def full_forward(x, edge_index, batch):
        # Glue (adjacency + pooling matrix) lives inside the same jit so the
        # whole forward is one compiled launch.
        a_norm = build_gcn_norm_adj(edge_index, N)              # [N, N] bf16
        pool = build_pool_matrix(batch, G)                      # [G, N] f32
        return gcn_forward(x, a_norm, pool, w1, b1, gamma, beta, w2, b2)

    out = jax.block_until_ready(full_forward(x, edge_index, batch))
    assert out.shape == (G, out_dim)
    # sanity: rows of log_softmax should exp-sum to ~1
    assert bool(jnp.allclose(jnp.exp(out).sum(-1), 1.0, atol=1e-3))
    print("KERNEL_OK")
</pallas_src>

<mosaic_0001>
module attributes {stable_mosaic.version = 11 : i64} {
  func.func private @main(%arg0: i32) attributes {dimension_semantics = [#tpu.dimension_semantics<core_parallel>], iteration_bounds = array<i64: 2>, tpu.core_type = #tpu.core_type<sc_scalar_subcore>, window_params = []} {
    return
  }
}

module attributes {stable_mosaic.version = 11 : i64} {
  func.func private @main(%arg0: i32) attributes {dimension_semantics = [#tpu.dimension_semantics<core_parallel>], iteration_bounds = array<i64: 2>, tpu.core_type = #tpu.core_type<sc_scalar_subcore>, window_params = []} {
    return
  }
}

module attributes {stable_mosaic.version = 11 : i64} {
  func.func @gcn_forward_kernel(%arg0: memref<32x8xbf16, #tpu.memory_space<vmem>>, %arg1: memref<32x32xbf16, #tpu.memory_space<vmem>>, %arg2: memref<4x32xf32, #tpu.memory_space<vmem>>, %arg3: memref<8x64xbf16, #tpu.memory_space<vmem>>, %arg4: memref<1x64xf32, #tpu.memory_space<vmem>>, %arg5: memref<1x64xf32, #tpu.memory_space<vmem>>, %arg6: memref<1x64xf32, #tpu.memory_space<vmem>>, %arg7: memref<64x4xbf16, #tpu.memory_space<vmem>>, %arg8: memref<1x4xf32, #tpu.memory_space<vmem>>, %arg9: memref<4x4xf32, #tpu.memory_space<vmem>>) attributes {dimension_semantics = [], scalar_prefetch = 0 : i64, scratch_operands = 0 : i64, tpu.core_type = #tpu.core_type<tc>} {
    %c0 = arith.constant 0 : index
    %c0_0 = arith.constant 0 : index
    %0 = vector.load %arg0[%c0, %c0_0] : memref<32x8xbf16, #tpu.memory_space<vmem>>, vector<32x8xbf16>
    %c0_1 = arith.constant 0 : index
    %c0_2 = arith.constant 0 : index
    %1 = vector.load %arg3[%c0_1, %c0_2] : memref<8x64xbf16, #tpu.memory_space<vmem>>, vector<8x64xbf16>
    %cst = arith.constant dense<0.000000e+00> : vector<32x64xf32>
    %2 = tpu.matmul %0, %1, %cst {dimension_numbers = #tpu.dot_dimension_numbers<[1], [0], [0], [1], [0, 0, 1, 1], [], []>} : vector<32x8xbf16>, vector<8x64xbf16>, vector<32x64xf32> -> vector<32x64xf32>
    %c0_3 = arith.constant 0 : index
    %c0_4 = arith.constant 0 : index
    %3 = vector.load %arg1[%c0_3, %c0_4] : memref<32x32xbf16, #tpu.memory_space<vmem>>, vector<32x32xbf16>
    %4 = arith.truncf %2 : vector<32x64xf32> to vector<32x64xbf16>
    %cst_5 = arith.constant dense<0.000000e+00> : vector<32x64xf32>
    %5 = tpu.matmul %3, %4, %cst_5 {dimension_numbers = #tpu.dot_dimension_numbers<[1], [0], [0], [1], [0, 0, 1, 1], [], []>} : vector<32x32xbf16>, vector<32x64xbf16>, vector<32x64xf32> -> vector<32x64xf32>
    %c0_6 = arith.constant 0 : index
    %c0_7 = arith.constant 0 : index
    %6 = vector.load %arg4[%c0_6, %c0_7] : memref<1x64xf32, #tpu.memory_space<vmem>>, vector<1x64xf32>
    %7 = vector.broadcast %6 : vector<1x64xf32> to vector<32x64xf32>
    %8 = arith.addf %5, %7 : vector<32x64xf32>
    %cst_8 = arith.constant dense<0.000000e+00> : vector<64xf32>
    %9 = vector.multi_reduction <add>, %8, %cst_8 [0] : vector<32x64xf32> to vector<64xf32>
    %10 = vector.shape_cast %9 : vector<64xf32> to vector<1x64xf32>
    %cst_9 = arith.constant 3.125000e-02 : f32
    %11 = vector.broadcast %cst_9 : f32 to vector<1x64xf32>
    %12 = arith.mulf %10, %11 : vector<1x64xf32>
    %13 = vector.broadcast %12 : vector<1x64xf32> to vector<32x64xf32>
    %14 = arith.subf %8, %13 : vector<32x64xf32>
    %15 = arith.mulf %14, %14 : vector<32x64xf32>
    %cst_10 = arith.constant dense<0.000000e+00> : vector<64xf32>
    %16 = vector.multi_reduction <add>, %15, %cst_10 [0] : vector<32x64xf32> to vector<64xf32>
    %17 = vector.shape_cast %16 : vector<64xf32> to vector<1x64xf32>
    %cst_11 = arith.constant 3.125000e-02 : f32
    %18 = vector.broadcast %cst_11 : f32 to vector<1x64xf32>
    %19 = arith.mulf %17, %18 : vector<1x64xf32>
    %c0_12 = arith.constant 0 : index
    %c0_13 = arith.constant 0 : index
    %20 = vector.load %arg5[%c0_12, %c0_13] : memref<1x64xf32, #tpu.memory_space<vmem>>, vector<1x64xf32>
    %cst_14 = arith.constant 9.99999974E-6 : f32
    %21 = vector.broadcast %cst_14 : f32 to vector<1x64xf32>
    %22 = arith.addf %19, %21 : vector<1x64xf32>
    %23 = math.rsqrt %22 : vector<1x64xf32>
    %24 = arith.mulf %20, %23 : vector<1x64xf32>
    %25 = vector.broadcast %24 : vector<1x64xf32> to vector<32x64xf32>
    %26 = arith.mulf %14, %25 : vector<32x64xf32>
    %c0_15 = arith.constant 0 : index
    %c0_16 = arith.constant 0 : index
    %27 = vector.load %arg6[%c0_15, %c0_16] : memref<1x64xf32, #tpu.memory_space<vmem>>, vector<1x64xf32>
    %28 = vector.broadcast %27 : vector<1x64xf32> to vector<32x64xf32>
    %29 = arith.addf %26, %28 : vector<32x64xf32>
    %cst_17 = arith.constant 0.000000e+00 : f32
    %30 = vector.broadcast %cst_17 : f32 to vector<32x64xf32>
    %31 = arith.maximumf %29, %30 : vector<32x64xf32>
    %c0_18 = arith.constant 0 : index
    %c0_19 = arith.constant 0 : index
    %32 = vector.load %arg2[%c0_18, %c0_19] : memref<4x32xf32, #tpu.memory_space<vmem>>, vector<4x32xf32>
    %cst_20 = arith.constant dense<0.000000e+00> : vector<4x64xf32>
    %33 = tpu.matmul %32, %31, %cst_20 {dimension_numbers = #tpu.dot_dimension_numbers<[1], [0], [0], [1], [0, 0, 1, 1], [], []>} : vector<4x32xf32>, vector<32x64xf32>, vector<4x64xf32> -> vector<4x64xf32>
    %34 = arith.truncf %33 : vector<4x64xf32> to vector<4x64xbf16>
    %c0_21 = arith.constant 0 : index
    %c0_22 = arith.constant 0 : index
    %35 = vector.load %arg7[%c0_21, %c0_22] : memref<64x4xbf16, #tpu.memory_space<vmem>>, vector<64x4xbf16>
    %cst_23 = arith.constant dense<0.000000e+00> : vector<4x4xf32>
    %36 = tpu.matmul %34, %35, %cst_23 {dimension_numbers = #tpu.dot_dimension_numbers<[1], [0], [0], [1], [0, 0, 1, 1], [], []>} : vector<4x64xbf16>, vector<64x4xbf16>, vector<4x4xf32> -> vector<4x4xf32>
    %c0_24 = arith.constant 0 : index
    %c0_25 = arith.constant 0 : index
    %37 = vector.load %arg8[%c0_24, %c0_25] : memref<1x4xf32, #tpu.memory_space<vmem>>, vector<1x4xf32>
    %38 = vector.broadcast %37 : vector<1x4xf32> to vector<4x4xf32>
    %39 = arith.addf %36, %38 : vector<4x4xf32>
    %cst_26 = arith.constant dense<0xFF800000> : vector<4xf32>
    %40 = vector.multi_reduction <maximumf>, %39, %cst_26 [1] : vector<4x4xf32> to vector<4xf32>
    %41 = vector.shape_cast %40 : vector<4xf32> to vector<4x1xf32>
    %42 = vector.broadcast %41 : vector<4x1xf32> to vector<4x4xf32>
    %43 = arith.subf %39, %42 : vector<4x4xf32>
    %44 = math.exp %43 : vector<4x4xf32>
    %cst_27 = arith.constant dense<0.000000e+00> : vector<4xf32>
    %45 = vector.multi_reduction <add>, %44, %cst_27 [1] : vector<4x4xf32> to vector<4xf32>
    %46 = vector.shape_cast %45 : vector<4xf32> to vector<4x1xf32>
    %47 = math.log %46 : vector<4x1xf32>
    %48 = vector.broadcast %47 : vector<4x1xf32> to vector<4x4xf32>
    %49 = arith.subf %43, %48 : vector<4x4xf32>
    %c0_28 = arith.constant 0 : index
    %c0_29 = arith.constant 0 : index
    %50 = vector.load %arg9[%c0_28, %c0_29] : memref<4x4xf32, #tpu.memory_space<vmem>>, vector<4x4xf32>
    tpu.vector_store %arg9[%c0_28, %c0_29], %49 {strides = array<i32>} : memref<4x4xf32, #tpu.memory_space<vmem>>, vector<4x4xf32>,
    return
  }
}

</mosaic_0001>

<bundles_post_ra>
// kernel: mul.1
= control target key start
LH: loop header
LB: loop body
LE: loop exit
PB: predicated region body
PF: predicated region fallthrough
CT: control target
= control target key end

     0   :  { %s34_s0 = inlined_call_operand.vmem [shape: f32[96], index: 0, kind: input, shape index: {}]   ;;  %s35_s1 = inlined_call_operand.vmem [shape: f32[96], index: 1, kind: input, shape index: {}]   ;;  %s36_s2 = inlined_call_operand.vmem [shape: f32[96], index: 2, kind: output, shape index: {}]  }
   0x1   :  { %v3_v0 = vld [vmem:[%s34_s0] sm:$0x1] }
   0x2   :  { %v4_v1 = vld [vmem:[%s35_s1] sm:$0x1] }
   0x3   :  { %v7_v2 = vmul.f32 %v4_v1, %v3_v0 }
   0x5   :  { %9 = vst [vmem:[%s36_s2] sm:$0x1] %v7_v2 }

// kernel: full_forward.1
= control target key start
LH: loop header
LB: loop body
LE: loop exit
PB: predicated region body
PF: predicated region fallthrough
CT: control target
= control target key end

     0   :  { %vm56_vm0 = vcmask 1043456   ;;  %vm49_vm1 = vcmask 64512   ;;  %s684_s0 = inlined_call_operand.vmem [shape: bf16[32,8], index: 0, kind: input, shape index: {}]   ;;  %s685_s1 = inlined_call_operand.vmem [shape: bf16[32,32], index: 1, kind: input, shape index: {}]   ;;  %s686_s2 = inlined_call_operand.vmem [shape: f32[4,32], index: 2, kind: input, shape index: {}]   ;;  %s687_s3 = inlined_call_operand.vmem [shape: bf16[8,64], index: 3, kind: input, shape index: {}]   ;;  %s688_s4 = inlined_call_operand.vmem [shape: f32[1,64], index: 4, kind: input, shape index: {}, may-alias: {4,6}]   ;;  %s689_s5 = inlined_call_operand.vmem [shape: f32[1,64], index: 5, kind: input, shape index: {}]   ;;  %s690_s6 = inlined_call_operand.vmem [shape: f32[1,64], index: 6, kind: input, shape index: {}, may-alias: {4,6}]   ;;  %s691_s7 = inlined_call_operand.vmem [shape: bf16[64,4], index: 7, kind: input, shape index: {}]   ;;  %s692_s8 = inlined_call_operand.vmem [shape: f32[1,4], index: 8, kind: input, shape index: {}]   ;;  %s693_s9 = inlined_call_operand.hbm [shape: f32[4,4], index: 9, kind: output, shape index: {}]  }
   0x1   :  { %v38_v0 = vld [vmem:[%s687_s3] sm:$0xf]  ;;  %v522_v3 = vld [vmem:[%s684_s0 + $0x8] sm:$0xff]  }
   0x2   :  { %v521_v1 = vld [vmem:[%s684_s0] sm:$0xff]   ;;  %516 = vmatprep.subr.msk.bf16.mxu0 %vm56_vm0, %v38_v0  ;;  %v58_v2 = vsel %vm56_vm0, %v38_v0, 0 }
   0x3   :  { %474 = vmatpush3.bf16.msra.mxu0 %v58_v2  ;;  %475 = vmatprep.mubr.msk.bf16.mxu0 %vm49_vm1, %v521_v1 }
   0x6   :  { %476 = vmatmul.mubr.msk.bf16.vlgmr.msra.gmra.mrb[0].mxu0 %vm49_vm1, %v522_v3 }
   0x7   :  { %14 = vsyncpa [#allocation3], 0  ;;  %v523_v4 = vld [vmem:[%s685_s1] sm:$0xff]   ;;  %vm132_vm2 = vcmask 261120   ;;  %v524_v11 = vld [vmem:[%s685_s1 + $0x8] sm:$0xff]   ;;  %v559_v12 = vmov 0.0|0.0   ;;  %v230_v63 = vlaneseq }
   0x8   :  { %483 = vmatprep.mubr.msk.bf16.mxu0 %vm132_vm2, %v523_v4  ;;  %vm560_vm3 = vmmov 0   ;;  %v561_v13 = vmov 0.0   ;;  %v525_v14 = vld [vmem:[%s691_s7] sm:$0xff]   ;;  %v526_v15 = vld [vmem:[%s691_s7 + $0x8] sm:$0xff]   ;;  %v527_v16 = vld [vmem:[%s691_s7 + $0x10] sm:$0xff]   ;;  %vm188_vm4 = vcmask 523264  }
   0x9   :  { %498 = vmatprep.subr.bf16.mxu1 %v561_v13  ;;  %506 = vmatprep.mubr.msk.bf16.mxu1 %vm560_vm3, %v561_v13  ;;  %v443_v17 = vld [vmem:[%s688_s4] ss:$0 sm:$0xff]  ;;  %v231_v0 = vshrl.u32 %v230_v63, 7  ;;  %vm411_vm5 = vcmask 27648  }
   0xa   :  { %499 = vmatpush3.bf16.msra.mxu1 %v525_v14  ;;  %v225_v1 = vld [vmem:[%s689_s5] sm:$0x1] }
   0xb   :  { %500 = vmatprep.subr.bf16.mxu1 %v561_v13  ;;  %v232_v2 = vsub.s32 0, %v231_v0 }
   0xe   :  { %501 = vmatpush3.bf16.msra.mxu1 %v526_v15 }
   0xf   :  { %502 = vmatprep.subr.bf16.mxu1 %v561_v13 }
  0x12   :  { %503 = vmatpush3.bf16.msra.mxu1 %v527_v16 }
  0x13   :  { %504 = vmatprep.subr.bf16.mxu1 %v561_v13 }
  0xd9   :  { %v477_v5 = vpop.f32.mrb[0].mxu0 }
  0xda   :  { %v94_v6 = vpop.f32.mrb[1].mxu0 }
  0xdb   :  { %v478_v7 = vpop.f32.mrb[2].mxu0 }
  0xdc   :  { %v114_v8 = vpack.c.bf16 %v478_v7, %v477_v5  ;;  %v97_v9 = vpop.f32.mrb[3].mxu0 }
  0xdd   :  { %v113_v10 = vpack.c.bf16 %v97_v9, %v94_v6  ;;  %v448_v6 = vld [vmem:[%s690_s6] ss:$0 sm:$0xff] }
  0xdf   :  { %479 = vmatprep.subr.bf16.mxu0 %v113_v10 }
  0xe0   :  { %480 = vmatpush3.bf16.msra.mxu0 %v113_v10 }
  0xe1   :  { %481 = vmatprep.subr.bf16.mxu0 %v114_v8 }
  0xe4   :  { %482 = vmatpush3.bf16.msra.mxu0 %v114_v8 }
  0xe5   :  { %510 = vmatprep.subr.bf16.mxu0 %v559_v12 }
  0xe7   :  { %484 = vmatmul.mubr.msk.bf16.vlgmr.msra.gmra.mrb[4].mxu0 %vm132_vm2, %v524_v11 }
  0xe8   :  { %495 = vmatprep.mubr.msk.f32.mxu0 %vm560_vm3, %v561_v13 }
 0x1ba   :  { %v485_v18 = vpop.f32.mrb[4].mxu0 }
 0x1bb   :  { %v173_v19 = vpop.f32.mrb[5].mxu0  ;;  %v182_v23 = vadd.f32 %v485_v18, %v443_v17 }
 0x1bc   :  { %v174_v20 = vadd.f32 %v443_v17, %v173_v19  ;;  %v486_v21 = vpop.f32.mrb[6].mxu0 }
 0x1bd   :  { %v176_v22 = vpop.f32.mrb[7].mxu0  ;;  %v185_v26 = vadd.f32 %v486_v21, %v443_v17  ;;  %v192_v29 = vsel %vm188_vm4, %v182_v23, 0.0 }
 0x1be   :  { %v177_v24 = vadd.f32 %v443_v17, %v176_v22  ;;  %v189_v25 = vsel %vm188_vm4, %v174_v20, 0.0  ;;  %v254_v22 = vld [vmem:[%s686_s2] sm:$0xf]  ;;  %s562_s2 = smov [#allocation2]  }
 0x1bf   :  { %v194_v31 = vsel %vm188_vm4, %v185_v26, 0.0 }
 0x1c0   :  { %v190_v27 = vsel %vm188_vm4, %v177_v24, 0.0 }
 0x1c1   :  { %v191_v28 = vadd.f32 %v190_v27, %v189_v25 }
 0x1c3   :  { %v193_v30 = vadd.f32 %v192_v29, %v191_v28 }
 0x1c5   :  { %v195_v32 = vadd.f32 %v194_v31, %v193_v30 }
 0x1c7   :  { %v196_v33 = vrot.slane %v195_v32, 4 }
 0x1c9   :  { %v197_v34 = vadd.f32 %v196_v33, %v195_v32 }
 0x1cb   :  { %v198_v35 = vrot.slane %v197_v34, 2 }
 0x1cd   :  { %v199_v36 = vadd.f32 %v198_v35, %v197_v34 }
 0x1cf   :  { %v200_v37 = vrot.slane %v199_v36, 1 }
 0x1d1   :  { %v201_v38 = vadd.f32 %v200_v37, %v199_v36 }
 0x1d3   :  { %v202_v39 = vmul.f32 0.03125, %v201_v38 }
 0x1d5   :  { %v203_v40 = vsub.f32 %v174_v20, %v202_v39  ;;  %v204_v41 = vsub.f32 %v177_v24, %v202_v39  ;;  %v205_v42 = vsub.f32 %v182_v23, %v202_v39  ;;  %v206_v43 = vsub.f32 %v185_v26, %v202_v39  ;;  %v528_v23 = vld [vmem:[%s691_s7 + $0x18] sm:$0xff]   ;;  %s431_s7 = sshll.u32 %s562_s2, 4  ;;  %s432_s7 = int_to_ptr.vmem [resolvable:$true] %s431_s7 }
 0x1d6   :  { %505 = vmatpush3.bf16.msra.mxu1 %v528_v23  ;;  %p540_p1 = scmp.lt.s32.totalorder %s432_s7, %s432_s7 }
 0x1d7   :  { %v207_v44 = vmul.f32 %v203_v40, %v203_v40  ;;  %v208_v45 = vmul.f32 %v204_v41, %v204_v41  ;;  %v209_v46 = vmul.f32 %v205_v42, %v205_v42  ;;  %v210_v47 = vmul.f32 %v206_v43, %v206_v43 }
 0x1d9   :  { %v211_v48 = vsel %vm188_vm4, %v207_v44, 0.0  ;;  %v212_v49 = vsel %vm188_vm4, %v208_v45, 0.0  ;;  %v214_v51 = vsel %vm188_vm4, %v209_v46, 0.0  ;;  %v216_v53 = vsel %vm188_vm4, %v210_v47, 0.0 }
 0x1da   :  { %v213_v50 = vadd.f32 %v212_v49, %v211_v48 }
 0x1dc   :  { %v215_v52 = vadd.f32 %v214_v51, %v213_v50 }
 0x1de   :  { %v217_v54 = vadd.f32 %v216_v53, %v215_v52 }
 0x1e0   :  { %v218_v55 = vrot.slane %v217_v54, 4 }
 0x1e2   :  { %v219_v56 = vadd.f32 %v218_v55, %v217_v54 }
 0x1e4   :  { %v220_v57 = vrot.slane %v219_v56, 2 }
 0x1e6   :  { %v221_v58 = vadd.f32 %v220_v57, %v219_v56 }
 0x1e8   :  { %v222_v59 = vrot.slane %v221_v58, 1 }
 0x1ea   :  { %v223_v60 = vadd.f32 %v222_v59, %v221_v58 }
 0x1ec   :  { %v224_v61 = vmul.f32 0.03125, %v223_v60 }
 0x1ee   :  { %v226_v62 = vadd.f32 1e-05, %v224_v61 }
 0x1f0   :  { %529 = vrsqrt.f32 %v226_v62 }
 0x1fa   :  { %v530_v3 = vpop.eup %529 }
 0x1fb   :  { %v228_v4 = vmul.f32 %v530_v3, %v225_v1 }
 0x1fd   :  { %v233_v5 = vrot.slane %v228_v4, %v232_v2 }
 0x1ff   :  { %v236_v7 = vmul.f32 %v233_v5, %v204_v41  ;;  %v235_v8 = vmul.f32 %v233_v5, %v203_v40  ;;  %v237_v9 = vmul.f32 %v233_v5, %v205_v42  ;;  %v238_v10 = vmul.f32 %v233_v5, %v206_v43 }
 0x201   :  { %v247_v11 = vadd.f32 %v448_v6, %v236_v7  ;;  %v246_v13 = vadd.f32 %v448_v6, %v235_v8  ;;  %v248_v14 = vadd.f32 %v448_v6, %v237_v9  ;;  %v249_v15 = vadd.f32 %v448_v6, %v238_v10 }
 0x203   :  { %v251_v16 = vmax.f32 %v247_v11, 0.0  ;;  %v250_v17 = vmax.f32 %v246_v13, 0.0  ;;  %v252_v18 = vmax.f32 %v248_v14, 0.0  ;;  %v253_v19 = vmax.f32 %v249_v15, 0.0 }
 0x205   :  { %v511_v20 = vpack.c.bf16 %v251_v16, %v250_v17  ;;  %v514_v21 = vpack.c.bf16 %v253_v19, %v252_v18 }
 0x207   :  { %512 = vmatpush3.bf16.msra.mxu0 %v511_v20 }
 0x208   :  { %513 = vmatprep.subr.bf16.mxu0 %v559_v12  ;;  %v450_v12 = vld [vmem:[%s692_s8] ss:$0 sm:$0xff]  ;;  %s535_s8 = scalar_lea.vmem %s432_s7, 64 }
 0x209   :  { %p536_p0 = scmp.ne.s32.totalorder %s432_s7, %s535_s8  ;;  %p541_p2 = scmp.lt.s32.totalorder %s535_s8, %s535_s8 }
 0x20b   :  { %515 = vmatpush3.bf16.msra.mxu0 %v514_v21  ;;  %p542_p3 = por %p541_p2, %p540_p1 }
 0x20d   :  { %p543_p4 = pnand %p542_p3, %p536_p0 }
 0x20e   :  { %496 = vmatmul.mubr.msk.f32.vlgmr.msra.gmra.mrb[8].mxu0 %vm132_vm2, %v254_v22 }
 0x2e1   :  { %v324_v24 = vpop.f32.mrb[8].mxu0 }
 0x2e2   :  { %v328_v25 = vpack.c.bf16 %v324_v24, %v324_v24  ;;  %v497_v26 = vpop.f32.mrb[9].mxu0 }
 0x2e4   :  { %507 = vmatmul.mubr.msk.bf16.vlgmr.msra.gmra.mrb[0].mxu1 %vm188_vm4, %v328_v25 }
 0x3b7   :  { %v405_v27 = vpop.f32.mrb[0].mxu1 }
 0x3b8   :  { %v406_v28 = vadd.f32 %v450_v12, %v405_v27  ;;  %v508_v29 = vpop.f32.mrb[1].mxu1 }
 0x3b9   :  { %v408_v30 = vpop.f32.mrb[2].mxu1 }
 0x3ba   :  { %v509_v31 = vpop.f32.mrb[3].mxu1  ;;  %v412_v32 = vsel %vm411_vm5, %v406_v28, -inf }
 0x3bb   :  { %413 = vmax.xlane.f32.xlu0 %v412_v32 }
 0x448   :  { %v414_v33 = vpop.xlane.xlu0 %413 }
 0x449   :  { %v415_v34 = vsub.f32 %v406_v28, %v414_v33 }
 0x44b   :  { %v416_v35 = vmul.f32 1.442695, %v415_v34 }
 0x44d   :  { %531 = vpow2.f32 %v416_v35 }
 0x457   :  { %v532_v36 = vpop.eup %531 }
 0x458   :  { %v418_v37 = vsel %vm411_vm5, %v532_v36, 0.0 }
 0x459   :  { %419 = vadd.xlane.f32.xlu0 %v418_v37 }
 0x4e6   :  { %v420_v38 = vpop.xlane.xlu0 %419 }
 0x4e7   :  { %533 = vlog2.f32 %v420_v38 }
 0x4f1   :  { %v534_v39 = vpop.eup %533 }
 0x4f2   :  { %v422_v40 = vmul.f32 0.6931472, %v534_v39 }
 0x4f4   :  { %v423_v41 = vsub.f32 %v415_v34, %v422_v40 }
 0x4f6   :  { %424 = vst.msk [vmem:[#allocation2] sm:$0xf] %vm411_vm5, %v423_v41 }
 0x4f7   :  { %546 = shalt.err (!%p543_p4)
}
 0x4f8   :  { %s547_s12 = scalar_lea.hbm %s693_s9, 64 }
 0x4f9   :  { %p548_p5 = scmp.ne.s32.totalorder %s693_s9, %s547_s12  ;;  %p551_p6 = scmp.lt.u32.totalorder %s547_s12, %s693_s9 }
 0x4fb   :  { %p553_p7 = pnand %p551_p6, %p548_p5 }
 0x4fd   :  { %556 = shalt.err (!%p553_p7)
}
 0x4fe   :  { %434 = dma.vmem_to_hbm [thread:$0]  %s432_s7, 64, %s693_s9, [#allocation3]  }
 0x4ff   :  { %557 = dma.done.wait [#allocation3], 64  }
 0x500   :  { %558 = vsyncadd [#allocation3], 4294967232 }
 0x501   :  { %438 = vsyncpa [#allocation3], 1 }

</bundles_post_ra>
